<compile_context>
chip_gen: v6e
topology: v6e:2x2x1
jax: 0.10.0
libtpu: 0.0.40
codegen_flags: <defaults>
</compile_context>

<pallas_src>
import functools
import math

import jax
import jax.numpy as jnp
from jax.experimental import pallas as pl
from jax.experimental.pallas import tpu as pltpu

EPS = 1e-6                          # LayerNorm eps from the PyTorch module
_INV_SQRT2 = 1.0 / math.sqrt(2.0)
_GELU_C0 = math.sqrt(2.0 / math.pi)


def _round_up(x, m):
    return (x + m - 1) // m * m


# ---------------------------------------------------------------------------
# Fused per-stage kernel: 3x(K=3*Cin dot) -> +bias -> LayerNorm(C) -> GELU
# ---------------------------------------------------------------------------
def _make_stage_kernel(ho, wo, c_real, c_pad, approximate_gelu):
    m = ho * wo
    inv_c = 1.0 / float(c_real)

    def kernel(ge_ref, go_ref, w_ref, s_ref, o_ref):
        # ge_ref: (1, (ho+1)*wo, 3*Ci)  even output-row-parity taps (cols kw=0|1|2)
        # go_ref: (1,  ho   *wo, 3*Ci)  odd  output-row-parity taps
        # w_ref : (3, 3*Ci, Cp)         per-kh conv weights, Cout zero-padded
        # s_ref : (8, Cp)               row0 = bias, row1 = gamma, row2 = beta
        # o_ref : (1, ho*wo, Cp)
        acc = None
        for kh in range(3):
            src = ge_ref if kh % 2 == 0 else go_ref
            r0 = (kh // 2) * wo                      # static row offset (0 or wo)
            lhs = src[0, r0:r0 + m, :]               # contiguous 2-D tap slice
            part = jnp.dot(lhs, w_ref[kh], preferred_element_type=jnp.float32)
            acc = part if acc is None else acc + part

        x = acc + s_ref[0:1, :]                      # conv bias (0 in pad lanes)

        # channels_first LayerNorm, one-pass stats.  Padded output lanes of x
        # are exactly 0 (zero weight columns / zero bias), so unmasked lane
        # sums already equal the sums over the real channels.
        u = jnp.sum(x, axis=-1, keepdims=True) * inv_c
        ex2 = jnp.sum(x * x, axis=-1, keepdims=True) * inv_c
        var = jnp.maximum(ex2 - u * u, 0.0)
        xn = (x - u) * jax.lax.rsqrt(var + EPS)      # rsqrt -> EUP slot
        xn = xn * s_ref[1:2, :] + s_ref[2:3, :]      # gamma/beta (0 in pad lanes)

        if approximate_gelu:
            # tanh GELU: the transcendental goes to the otherwise idle EUP.
            y = 0.5 * xn * (1.0 + jnp.tanh(_GELU_C0 * (xn + 0.044715 * xn * xn * xn)))
        else:
            # exact erf GELU == torch.nn.GELU(approximate='none')
            y = 0.5 * xn * (1.0 + jax.lax.erf(xn * _INV_SQRT2))
        o_ref[0] = y.astype(o_ref.dtype)             # lane-dense (Cp % 128 == 0)

    return kernel


# ---------------------------------------------------------------------------
# One ConvBlock1 stage
# ---------------------------------------------------------------------------
def _conv3x3s2_ln_gelu(x_nhwc, w, b, gamma, beta, *, out_dtype, compute_dtype,
                       approximate_gelu):
    """Conv2d(k=3, s=2, p=1) -> LayerNorm(channels_first) -> GELU.

    Returns (y, Cout) with y of shape (N, Ho, Wo, Cp), Cp = round_up(Cout, 128);
    channels >= Cout are exactly zero so the next stage can consume the padded
    layout directly.
    """
    N, H, W, Cx = x_nhwc.shape
    _, _, Ci, Co = w.shape
    assert Cx >= Ci, (Cx, Ci)
    ho = (H - 1) // 2 + 1
    wo = (W - 1) // 2 + 1
    m = ho * wo
    cp = _round_up(Co, 128)          # lane-dense output block (unmasked vst)
    k3 = 3 * Ci                      # per-dot contraction dim

    # ---- XLA-side tap construction (replaces HBM-materialized im2col) ------
    # Column phases kw=0/1/2 of the spatially zero-padded input, concatenated
    # along channels, split by output-row parity and spatially flattened.  The
    # channel slice [:Ci] drops stage-1's zero pad lanes and fuses into the
    # same copy (no-op in production shapes where channels % 128 == 0).
    xq = x_nhwc[..., :Ci].astype(compute_dtype)
    xp = jnp.pad(xq, ((0, 0), (1, 1), (1, 1), (0, 0)))        # conv zero pad

    def gather(parity, rows):
        parts = [xp[:, parity::2, kw::2, :][:, :rows, :wo, :] for kw in range(3)]
        return jnp.concatenate(parts, axis=-1).reshape(N, rows * wo, k3)

    ge = gather(0, ho + 1)           # even output-row parity (needs +1 halo row)
    go = gather(1, ho)               # odd  output-row parity

    # per-kh weights (3, 3*Ci, Cp): (kh, kw, c, o) -> (kh, kw*Ci + c, o)
    w3 = jnp.pad(w.reshape(3, k3, Co).astype(compute_dtype),
                 ((0, 0), (0, 0), (0, cp - Co)))
    scales = jnp.pad(jnp.stack([b, gamma, beta], axis=0).astype(jnp.float32),
                     ((0, 5), (0, cp - Co)))

    kernel = _make_stage_kernel(ho, wo, Co, cp, approximate_gelu)

    in_item = jnp.dtype(compute_dtype).itemsize
    out_item = jnp.dtype(out_dtype).itemsize
    # Advisory cost from the *real* problem dims (not padded ones).
    cost = pl.CostEstimate(
        flops=2 * N * m * 9 * Ci * Co,
        transcendentals=2 * N * m * Co,
        bytes_accessed=(N * (2 * ho + 1) * wo * k3 * in_item     # taps
                        + 9 * Ci * Co * in_item                  # weights
                        + 3 * Co * 4                             # bias/gamma/beta
                        + N * m * Co * out_item),                # output
    )

    out = pl.pallas_call(
        kernel,
        out_shape=jax.ShapeDtypeStruct((N, m, cp), out_dtype),
        grid_spec=pltpu.PrefetchScalarGridSpec(
            num_scalar_prefetch=0,
            grid=(N,),    # >= 2 steps for batch >= 2 -> both v7x TCs get work
            in_specs=[
                pl.BlockSpec((1, (ho + 1) * wo, k3), lambda n: (n, 0, 0)),
                pl.BlockSpec((1, ho * wo, k3), lambda n: (n, 0, 0)),
                pl.BlockSpec((3, k3, cp), lambda n: (0, 0, 0)),   # VMEM-resident
                pl.BlockSpec((8, cp), lambda n: (0, 0)),          # VMEM-resident
            ],
            out_specs=pl.BlockSpec((1, m, cp), lambda n: (n, 0, 0)),
        ),
        compiler_params=pltpu.CompilerParams(
            dimension_semantics=("parallel",),
        ),
        cost_estimate=cost,
    )(ge, go, w3, scales)

    # (N, ho*wo, Cp) -> (N, ho, wo, Cp): contiguous row-major, free reshape.
    return out.reshape(N, ho, wo, cp), Co


# ---------------------------------------------------------------------------
# ConvBlock1 forward
# ---------------------------------------------------------------------------
def conv_block1_forward(x_nchw, params, *, compute_dtype=jnp.bfloat16,
                        out_dtype=jnp.float32, approximate_gelu=True):
    """x: (N, 3, H, W) NCHW like PyTorch; returns (N, 2*planes, H//4, W//4)."""
    x = jnp.transpose(x_nchw, (0, 2, 3, 1))             # NCHW -> NHWC

    # stage 1: Conv2d(3, planes, 3, s=2, p=1) -> LN(channels_first) -> GELU
    y1, _ = _conv3x3s2_ln_gelu(
        x, params["w1"], params["b1"], params["ln1_w"], params["ln1_b"],
        out_dtype=compute_dtype, compute_dtype=compute_dtype,
        approximate_gelu=approximate_gelu)

    # stage 2 consumes stage 1's 128-lane padded output directly (padded
    # channels are exactly zero; no slice / re-pad round trip in between).
    y2, c2 = _conv3x3s2_ln_gelu(
        y1, params["w2"], params["b2"], params["ln2_w"], params["ln2_b"],
        out_dtype=out_dtype, compute_dtype=compute_dtype,
        approximate_gelu=approximate_gelu)

    return jnp.transpose(y2[..., :c2], (0, 3, 1, 2))     # NHWC -> NCHW


def init_params(key, planes):
    k1, k2, k3, k4 = jax.random.split(key, 4)
    fan1 = 3 * 3 * 3
    fan2 = 3 * 3 * planes
    return {
        # conv weights stored as (kh, kw, Cin, Cout)
        "w1": jax.random.normal(k1, (3, 3, 3, planes), jnp.float32) / math.sqrt(fan1),
        "b1": jax.random.normal(k2, (planes,), jnp.float32) * 0.01,
        "ln1_w": jnp.ones((planes,), jnp.float32),
        "ln1_b": jnp.zeros((planes,), jnp.float32),
        "w2": jax.random.normal(k3, (3, 3, planes, 2 * planes), jnp.float32)
        / math.sqrt(fan2),
        "b2": jax.random.normal(k4, (2 * planes,), jnp.float32) * 0.01,
        "ln2_w": jnp.ones((2 * planes,), jnp.float32),
        "ln2_b": jnp.zeros((2 * planes,), jnp.float32),
    }


# ---------------------------------------------------------------------------
# Pure-JAX reference (f32, exact-erf GELU) for correctness checks
# ---------------------------------------------------------------------------
def _reference_forward(x_nchw, params):
    def stage(x, w, b, g, beta):
        w_oihw = jnp.transpose(w, (3, 2, 0, 1))
        y = jax.lax.conv_general_dilated(
            x, w_oihw, window_strides=(2, 2), padding=((1, 1), (1, 1)),
            dimension_numbers=("NCHW", "OIHW", "NCHW"),
        ) + b[None, :, None, None]
        u = jnp.mean(y, axis=1, keepdims=True)
        s = jnp.mean((y - u) ** 2, axis=1, keepdims=True)
        y = (y - u) / jnp.sqrt(s + EPS)
        y = g[None, :, None, None] * y + beta[None, :, None, None]
        return 0.5 * y * (1.0 + jax.lax.erf(y * _INV_SQRT2))

    y = stage(x_nchw, params["w1"], params["b1"], params["ln1_w"], params["ln1_b"])
    y = stage(y, params["w2"], params["b2"], params["ln2_w"], params["ln2_b"])
    return y


if __name__ == "__main__":
    key = jax.random.PRNGKey(0)
    k_x, k_p = jax.random.split(key)

    planes = 8                                              # small demo config
    x = jax.random.normal(k_x, (2, 3, 16, 16), jnp.float32)  # NCHW like PyTorch
    params = init_params(k_p, planes)

    ref = jax.block_until_ready(_reference_forward(x, params))

    # Strict parity: f32 matmuls + exact erf GELU (torch.nn.GELU default).
    fwd_strict = jax.jit(functools.partial(
        conv_block1_forward, compute_dtype=jnp.float32, approximate_gelu=False))
    out_f32 = jax.block_until_ready(fwd_strict(x, params))
    assert out_f32.shape == (2, 2 * planes, 4, 4), out_f32.shape
    err = float(jnp.max(jnp.abs(out_f32 - ref)))
    assert err < 2e-3, f"f32 parity error too large: {err}"

    # Fast path (default): bf16 MXU inputs, bf16 inter-stage activation,
    # tanh GELU -> loose tolerance vs the exact-erf f32 reference.
    fwd_fast = jax.jit(conv_block1_forward)
    out_fast = jax.block_until_ready(fwd_fast(x, params))
    assert out_fast.shape == (2, 2 * planes, 4, 4), out_fast.shape
    err = float(jnp.max(jnp.abs(out_fast - ref)))
    assert err < 1.5e-1, f"bf16 fast-path error too large: {err}"

    print("KERNEL_OK")
</pallas_src>

<mosaic_0001>
module attributes {stable_mosaic.version = 11 : i64} {
  func.func @kernel(%arg0: i32, %arg1: memref<1x72x9xf32, #tpu.memory_space<vmem>>, %arg2: memref<1x64x9xf32, #tpu.memory_space<vmem>>, %arg3: memref<3x9x128xf32, #tpu.memory_space<vmem>>, %arg4: memref<8x128xf32, #tpu.memory_space<vmem>>, %arg5: memref<1x64x128xf32, #tpu.memory_space<vmem>>) attributes {dimension_semantics = [#tpu.dimension_semantics<parallel>], iteration_bounds = array<i64: 2>, scalar_prefetch = 0 : i64, scratch_operands = 0 : i64, tpu.core_type = #tpu.core_type<tc>, window_params = [{transform_indices = @transform_0, window_bounds = array<i64: 1, 72, 9>}, {transform_indices = @transform_1, window_bounds = array<i64: 1, 64, 9>}, {pipeline_mode = #tpu.pipeline_mode<synchronous>, transform_indices = @transform_2, window_bounds = array<i64: 3, 9, 128>}, {pipeline_mode = #tpu.pipeline_mode<synchronous>, transform_indices = @transform_3, window_bounds = array<i64: 8, 128>}, {transform_indices = @transform_4, window_bounds = array<i64: 1, 64, 128>}]} {
    %c0 = arith.constant 0 : index
    %c0_0 = arith.constant 0 : index
    %c0_1 = arith.constant 0 : index
    %0 = vector.load %arg1[%c0, %c0_0, %c0_1] : memref<1x72x9xf32, #tpu.memory_space<vmem>>, vector<1x64x9xf32>
    %1 = vector.shape_cast %0 : vector<1x64x9xf32> to vector<64x9xf32>
    %c0_2 = arith.constant 0 : index
    %c0_3 = arith.constant 0 : index
    %c0_4 = arith.constant 0 : index
    %2 = vector.load %arg3[%c0_2, %c0_3, %c0_4] : memref<3x9x128xf32, #tpu.memory_space<vmem>>, vector<1x9x128xf32>
    %3 = vector.shape_cast %2 : vector<1x9x128xf32> to vector<9x128xf32>
    %cst = arith.constant dense<0.000000e+00> : vector<64x128xf32>
    %4 = tpu.matmul %1, %3, %cst {dimension_numbers = #tpu.dot_dimension_numbers<[1], [0], [0], [1], [0, 0, 1, 1], [], []>} : vector<64x9xf32>, vector<9x128xf32>, vector<64x128xf32> -> vector<64x128xf32>
    %c0_5 = arith.constant 0 : index
    %c0_6 = arith.constant 0 : index
    %c0_7 = arith.constant 0 : index
    %5 = vector.load %arg2[%c0_5, %c0_6, %c0_7] : memref<1x64x9xf32, #tpu.memory_space<vmem>>, vector<1x64x9xf32>
    %6 = vector.shape_cast %5 : vector<1x64x9xf32> to vector<64x9xf32>
    %c1 = arith.constant 1 : index
    %c0_8 = arith.constant 0 : index
    %c0_9 = arith.constant 0 : index
    %7 = vector.load %arg3[%c1, %c0_8, %c0_9] : memref<3x9x128xf32, #tpu.memory_space<vmem>>, vector<1x9x128xf32>
    %8 = vector.shape_cast %7 : vector<1x9x128xf32> to vector<9x128xf32>
    %cst_10 = arith.constant dense<0.000000e+00> : vector<64x128xf32>
    %9 = tpu.matmul %6, %8, %cst_10 {dimension_numbers = #tpu.dot_dimension_numbers<[1], [0], [0], [1], [0, 0, 1, 1], [], []>} : vector<64x9xf32>, vector<9x128xf32>, vector<64x128xf32> -> vector<64x128xf32>
    %10 = arith.addf %4, %9 : vector<64x128xf32>
    %c0_11 = arith.constant 0 : index
    %c8 = arith.constant 8 : index
    %c0_12 = arith.constant 0 : index
    %11 = vector.load %arg1[%c0_11, %c8, %c0_12] : memref<1x72x9xf32, #tpu.memory_space<vmem>>, vector<1x64x9xf32>
    %12 = vector.shape_cast %11 : vector<1x64x9xf32> to vector<64x9xf32>
    %c2 = arith.constant 2 : index
    %c0_13 = arith.constant 0 : index
    %c0_14 = arith.constant 0 : index
    %13 = vector.load %arg3[%c2, %c0_13, %c0_14] : memref<3x9x128xf32, #tpu.memory_space<vmem>>, vector<1x9x128xf32>
    %14 = vector.shape_cast %13 : vector<1x9x128xf32> to vector<9x128xf32>
    %cst_15 = arith.constant dense<0.000000e+00> : vector<64x128xf32>
    %15 = tpu.matmul %12, %14, %cst_15 {dimension_numbers = #tpu.dot_dimension_numbers<[1], [0], [0], [1], [0, 0, 1, 1], [], []>} : vector<64x9xf32>, vector<9x128xf32>, vector<64x128xf32> -> vector<64x128xf32>
    %16 = arith.addf %10, %15 : vector<64x128xf32>
    %c0_16 = arith.constant 0 : index
    %c0_17 = arith.constant 0 : index
    %17 = vector.load %arg4[%c0_16, %c0_17] : memref<8x128xf32, #tpu.memory_space<vmem>>, vector<1x128xf32>
    %18 = vector.broadcast %17 : vector<1x128xf32> to vector<64x128xf32>
    %19 = arith.addf %16, %18 : vector<64x128xf32>
    %cst_18 = arith.constant dense<0.000000e+00> : vector<64xf32>
    %20 = vector.multi_reduction <add>, %19, %cst_18 [1] : vector<64x128xf32> to vector<64xf32>
    %21 = vector.shape_cast %20 : vector<64xf32> to vector<64x1xf32>
    %cst_19 = arith.constant 1.250000e-01 : f32
    %22 = vector.broadcast %cst_19 : f32 to vector<64x1xf32>
    %23 = arith.mulf %21, %22 : vector<64x1xf32>
    %24 = arith.mulf %19, %19 : vector<64x128xf32>
    %cst_20 = arith.constant dense<0.000000e+00> : vector<64xf32>
    %25 = vector.multi_reduction <add>, %24, %cst_20 [1] : vector<64x128xf32> to vector<64xf32>
    %26 = vector.shape_cast %25 : vector<64xf32> to vector<64x1xf32>
    %cst_21 = arith.constant 1.250000e-01 : f32
    %27 = vector.broadcast %cst_21 : f32 to vector<64x1xf32>
    %28 = arith.mulf %26, %27 : vector<64x1xf32>
    %29 = arith.mulf %23, %23 : vector<64x1xf32>
    %30 = arith.subf %28, %29 : vector<64x1xf32>
    %cst_22 = arith.constant 0.000000e+00 : f32
    %31 = vector.broadcast %cst_22 : f32 to vector<64x1xf32>
    %32 = arith.maximumf %30, %31 : vector<64x1xf32>
    %33 = vector.broadcast %23 : vector<64x1xf32> to vector<64x128xf32>
    %34 = arith.subf %19, %33 : vector<64x128xf32>
    %cst_23 = arith.constant 9.99999997E-7 : f32
    %35 = vector.broadcast %cst_23 : f32 to vector<64x1xf32>
    %36 = arith.addf %32, %35 : vector<64x1xf32>
    %37 = math.rsqrt %36 : vector<64x1xf32>
    %38 = vector.broadcast %37 : vector<64x1xf32> to vector<64x128xf32>
    %39 = arith.mulf %34, %38 : vector<64x128xf32>
    %c1_24 = arith.constant 1 : index
    %c0_25 = arith.constant 0 : index
    %40 = vector.load %arg4[%c1_24, %c0_25] : memref<8x128xf32, #tpu.memory_space<vmem>>, vector<1x128xf32>
    %41 = vector.broadcast %40 : vector<1x128xf32> to vector<64x128xf32>
    %42 = arith.mulf %39, %41 : vector<64x128xf32>
    %c2_26 = arith.constant 2 : index
    %c0_27 = arith.constant 0 : index
    %43 = vector.load %arg4[%c2_26, %c0_27] : memref<8x128xf32, #tpu.memory_space<vmem>>, vector<1x128xf32>
    %44 = vector.broadcast %43 : vector<1x128xf32> to vector<64x128xf32>
    %45 = arith.addf %42, %44 : vector<64x128xf32>
    %cst_28 = arith.constant 5.000000e-01 : f32
    %46 = vector.broadcast %cst_28 : f32 to vector<64x128xf32>
    %47 = arith.mulf %46, %45 : vector<64x128xf32>
    %cst_29 = arith.constant 0.707106769 : f32
    %48 = vector.broadcast %cst_29 : f32 to vector<64x128xf32>
    %49 = arith.mulf %45, %48 : vector<64x128xf32>
    %50 = math.erf %49 : vector<64x128xf32>
    %cst_30 = arith.constant 1.000000e+00 : f32
    %51 = vector.broadcast %cst_30 : f32 to vector<64x128xf32>
    %52 = arith.addf %51, %50 : vector<64x128xf32>
    %53 = arith.mulf %47, %52 : vector<64x128xf32>
    %c0_31 = arith.constant 0 : index
    %c0_32 = arith.constant 0 : index
    %c0_33 = arith.constant 0 : index
    %54 = vector.load %arg5[%c0_31, %c0_32, %c0_33] : memref<1x64x128xf32, #tpu.memory_space<vmem>>, vector<1x64x128xf32>
    %55 = vector.shape_cast %54 : vector<1x64x128xf32> to vector<64x128xf32>
    %56 = vector.shape_cast %53 : vector<64x128xf32> to vector<1x64x128xf32>
    tpu.vector_store %arg5[%c0_31, %c0_32, %c0_33], %56 {strides = array<i32>} : memref<1x64x128xf32, #tpu.memory_space<vmem>>, vector<1x64x128xf32>,
    return
  }
  func.func @transform_0(%arg0: i32) -> (i32, i32, i32) {
    %c0_i32 = arith.constant 0 : i32
    %c0_i32_0 = arith.constant 0 : i32
    %c0_i32_1 = arith.constant 0 : i32
    return %arg0, %c0_i32, %c0_i32_0 : i32, i32, i32
  }
  func.func @transform_1(%arg0: i32) -> (i32, i32, i32) {
    %c0_i32 = arith.constant 0 : i32
    %c0_i32_0 = arith.constant 0 : i32
    %c0_i32_1 = arith.constant 0 : i32
    return %arg0, %c0_i32, %c0_i32_0 : i32, i32, i32
  }
  func.func @transform_2(%arg0: i32) -> (i32, i32, i32) {
    %c0_i32 = arith.constant 0 : i32
    %c0_i32_0 = arith.constant 0 : i32
    %c0_i32_1 = arith.constant 0 : i32
    %c0_i32_2 = arith.constant 0 : i32
    return %c0_i32, %c0_i32_0, %c0_i32_1 : i32, i32, i32
  }
  func.func @transform_3(%arg0: i32) -> (i32, i32) {
    %c0_i32 = arith.constant 0 : i32
    %c0_i32_0 = arith.constant 0 : i32
    %c0_i32_1 = arith.constant 0 : i32
    return %c0_i32, %c0_i32_0 : i32, i32
  }
  func.func @transform_4(%arg0: i32) -> (i32, i32, i32) {
    %c0_i32 = arith.constant 0 : i32
    %c0_i32_0 = arith.constant 0 : i32
    %c0_i32_1 = arith.constant 0 : i32
    return %arg0, %c0_i32, %c0_i32_0 : i32, i32, i32
  }
}

module attributes {stable_mosaic.version = 11 : i64} {
  func.func @kernel(%arg0: i32, %arg1: memref<1x20x24xf32, #tpu.memory_space<vmem>>, %arg2: memref<1x16x24xf32, #tpu.memory_space<vmem>>, %arg3: memref<3x24x128xf32, #tpu.memory_space<vmem>>, %arg4: memref<8x128xf32, #tpu.memory_space<vmem>>, %arg5: memref<1x16x128xf32, #tpu.memory_space<vmem>>) attributes {dimension_semantics = [#tpu.dimension_semantics<parallel>], iteration_bounds = array<i64: 2>, scalar_prefetch = 0 : i64, scratch_operands = 0 : i64, tpu.core_type = #tpu.core_type<tc>, window_params = [{transform_indices = @transform_0, window_bounds = array<i64: 1, 20, 24>}, {transform_indices = @transform_1, window_bounds = array<i64: 1, 16, 24>}, {pipeline_mode = #tpu.pipeline_mode<synchronous>, transform_indices = @transform_2, window_bounds = array<i64: 3, 24, 128>}, {pipeline_mode = #tpu.pipeline_mode<synchronous>, transform_indices = @transform_3, window_bounds = array<i64: 8, 128>}, {transform_indices = @transform_4, window_bounds = array<i64: 1, 16, 128>}]} {
    %c0 = arith.constant 0 : index
    %c0_0 = arith.constant 0 : index
    %c0_1 = arith.constant 0 : index
    %0 = vector.load %arg1[%c0, %c0_0, %c0_1] : memref<1x20x24xf32, #tpu.memory_space<vmem>>, vector<1x16x24xf32>
    %1 = vector.shape_cast %0 : vector<1x16x24xf32> to vector<16x24xf32>
    %c0_2 = arith.constant 0 : index
    %c0_3 = arith.constant 0 : index
    %c0_4 = arith.constant 0 : index
    %2 = vector.load %arg3[%c0_2, %c0_3, %c0_4] : memref<3x24x128xf32, #tpu.memory_space<vmem>>, vector<1x24x128xf32>
    %3 = vector.shape_cast %2 : vector<1x24x128xf32> to vector<24x128xf32>
    %cst = arith.constant dense<0.000000e+00> : vector<16x128xf32>
    %4 = tpu.matmul %1, %3, %cst {dimension_numbers = #tpu.dot_dimension_numbers<[1], [0], [0], [1], [0, 0, 1, 1], [], []>} : vector<16x24xf32>, vector<24x128xf32>, vector<16x128xf32> -> vector<16x128xf32>
    %c0_5 = arith.constant 0 : index
    %c0_6 = arith.constant 0 : index
    %c0_7 = arith.constant 0 : index
    %5 = vector.load %arg2[%c0_5, %c0_6, %c0_7] : memref<1x16x24xf32, #tpu.memory_space<vmem>>, vector<1x16x24xf32>
    %6 = vector.shape_cast %5 : vector<1x16x24xf32> to vector<16x24xf32>
    %c1 = arith.constant 1 : index
    %c0_8 = arith.constant 0 : index
    %c0_9 = arith.constant 0 : index
    %7 = vector.load %arg3[%c1, %c0_8, %c0_9] : memref<3x24x128xf32, #tpu.memory_space<vmem>>, vector<1x24x128xf32>
    %8 = vector.shape_cast %7 : vector<1x24x128xf32> to vector<24x128xf32>
    %cst_10 = arith.constant dense<0.000000e+00> : vector<16x128xf32>
    %9 = tpu.matmul %6, %8, %cst_10 {dimension_numbers = #tpu.dot_dimension_numbers<[1], [0], [0], [1], [0, 0, 1, 1], [], []>} : vector<16x24xf32>, vector<24x128xf32>, vector<16x128xf32> -> vector<16x128xf32>
    %10 = arith.addf %4, %9 : vector<16x128xf32>
    %c0_11 = arith.constant 0 : index
    %c4 = arith.constant 4 : index
    %c0_12 = arith.constant 0 : index
    %11 = vector.load %arg1[%c0_11, %c4, %c0_12] : memref<1x20x24xf32, #tpu.memory_space<vmem>>, vector<1x16x24xf32>
    %12 = vector.shape_cast %11 : vector<1x16x24xf32> to vector<16x24xf32>
    %c2 = arith.constant 2 : index
    %c0_13 = arith.constant 0 : index
    %c0_14 = arith.constant 0 : index
    %13 = vector.load %arg3[%c2, %c0_13, %c0_14] : memref<3x24x128xf32, #tpu.memory_space<vmem>>, vector<1x24x128xf32>
    %14 = vector.shape_cast %13 : vector<1x24x128xf32> to vector<24x128xf32>
    %cst_15 = arith.constant dense<0.000000e+00> : vector<16x128xf32>
    %15 = tpu.matmul %12, %14, %cst_15 {dimension_numbers = #tpu.dot_dimension_numbers<[1], [0], [0], [1], [0, 0, 1, 1], [], []>} : vector<16x24xf32>, vector<24x128xf32>, vector<16x128xf32> -> vector<16x128xf32>
    %16 = arith.addf %10, %15 : vector<16x128xf32>
    %c0_16 = arith.constant 0 : index
    %c0_17 = arith.constant 0 : index
    %17 = vector.load %arg4[%c0_16, %c0_17] : memref<8x128xf32, #tpu.memory_space<vmem>>, vector<1x128xf32>
    %18 = vector.broadcast %17 : vector<1x128xf32> to vector<16x128xf32>
    %19 = arith.addf %16, %18 : vector<16x128xf32>
    %cst_18 = arith.constant dense<0.000000e+00> : vector<16xf32>
    %20 = vector.multi_reduction <add>, %19, %cst_18 [1] : vector<16x128xf32> to vector<16xf32>
    %21 = vector.shape_cast %20 : vector<16xf32> to vector<16x1xf32>
    %cst_19 = arith.constant 6.250000e-02 : f32
    %22 = vector.broadcast %cst_19 : f32 to vector<16x1xf32>
    %23 = arith.mulf %21, %22 : vector<16x1xf32>
    %24 = arith.mulf %19, %19 : vector<16x128xf32>
    %cst_20 = arith.constant dense<0.000000e+00> : vector<16xf32>
    %25 = vector.multi_reduction <add>, %24, %cst_20 [1] : vector<16x128xf32> to vector<16xf32>
    %26 = vector.shape_cast %25 : vector<16xf32> to vector<16x1xf32>
    %cst_21 = arith.constant 6.250000e-02 : f32
    %27 = vector.broadcast %cst_21 : f32 to vector<16x1xf32>
    %28 = arith.mulf %26, %27 : vector<16x1xf32>
    %29 = arith.mulf %23, %23 : vector<16x1xf32>
    %30 = arith.subf %28, %29 : vector<16x1xf32>
    %cst_22 = arith.constant 0.000000e+00 : f32
    %31 = vector.broadcast %cst_22 : f32 to vector<16x1xf32>
    %32 = arith.maximumf %30, %31 : vector<16x1xf32>
    %33 = vector.broadcast %23 : vector<16x1xf32> to vector<16x128xf32>
    %34 = arith.subf %19, %33 : vector<16x128xf32>
    %cst_23 = arith.constant 9.99999997E-7 : f32
    %35 = vector.broadcast %cst_23 : f32 to vector<16x1xf32>
    %36 = arith.addf %32, %35 : vector<16x1xf32>
    %37 = math.rsqrt %36 : vector<16x1xf32>
    %38 = vector.broadcast %37 : vector<16x1xf32> to vector<16x128xf32>
    %39 = arith.mulf %34, %38 : vector<16x128xf32>
    %c1_24 = arith.constant 1 : index
    %c0_25 = arith.constant 0 : index
    %40 = vector.load %arg4[%c1_24, %c0_25] : memref<8x128xf32, #tpu.memory_space<vmem>>, vector<1x128xf32>
    %41 = vector.broadcast %40 : vector<1x128xf32> to vector<16x128xf32>
    %42 = arith.mulf %39, %41 : vector<16x128xf32>
    %c2_26 = arith.constant 2 : index
    %c0_27 = arith.constant 0 : index
    %43 = vector.load %arg4[%c2_26, %c0_27] : memref<8x128xf32, #tpu.memory_space<vmem>>, vector<1x128xf32>
    %44 = vector.broadcast %43 : vector<1x128xf32> to vector<16x128xf32>
    %45 = arith.addf %42, %44 : vector<16x128xf32>
    %cst_28 = arith.constant 5.000000e-01 : f32
    %46 = vector.broadcast %cst_28 : f32 to vector<16x128xf32>
    %47 = arith.mulf %46, %45 : vector<16x128xf32>
    %cst_29 = arith.constant 0.707106769 : f32
    %48 = vector.broadcast %cst_29 : f32 to vector<16x128xf32>
    %49 = arith.mulf %45, %48 : vector<16x128xf32>
    %50 = math.erf %49 : vector<16x128xf32>
    %cst_30 = arith.constant 1.000000e+00 : f32
    %51 = vector.broadcast %cst_30 : f32 to vector<16x128xf32>
    %52 = arith.addf %51, %50 : vector<16x128xf32>
    %53 = arith.mulf %47, %52 : vector<16x128xf32>
    %c0_31 = arith.constant 0 : index
    %c0_32 = arith.constant 0 : index
    %c0_33 = arith.constant 0 : index
    %54 = vector.load %arg5[%c0_31, %c0_32, %c0_33] : memref<1x16x128xf32, #tpu.memory_space<vmem>>, vector<1x16x128xf32>
    %55 = vector.shape_cast %54 : vector<1x16x128xf32> to vector<16x128xf32>
    %56 = vector.shape_cast %53 : vector<16x128xf32> to vector<1x16x128xf32>
    tpu.vector_store %arg5[%c0_31, %c0_32, %c0_33], %56 {strides = array<i32>} : memref<1x16x128xf32, #tpu.memory_space<vmem>>, vector<1x16x128xf32>,
    return
  }
  func.func @transform_0(%arg0: i32) -> (i32, i32, i32) {
    %c0_i32 = arith.constant 0 : i32
    %c0_i32_0 = arith.constant 0 : i32
    %c0_i32_1 = arith.constant 0 : i32
    return %arg0, %c0_i32, %c0_i32_0 : i32, i32, i32
  }
  func.func @transform_1(%arg0: i32) -> (i32, i32, i32) {
    %c0_i32 = arith.constant 0 : i32
    %c0_i32_0 = arith.constant 0 : i32
    %c0_i32_1 = arith.constant 0 : i32
    return %arg0, %c0_i32, %c0_i32_0 : i32, i32, i32
  }
  func.func @transform_2(%arg0: i32) -> (i32, i32, i32) {
    %c0_i32 = arith.constant 0 : i32
    %c0_i32_0 = arith.constant 0 : i32
    %c0_i32_1 = arith.constant 0 : i32
    %c0_i32_2 = arith.constant 0 : i32
    return %c0_i32, %c0_i32_0, %c0_i32_1 : i32, i32, i32
  }
  func.func @transform_3(%arg0: i32) -> (i32, i32) {
    %c0_i32 = arith.constant 0 : i32
    %c0_i32_0 = arith.constant 0 : i32
    %c0_i32_1 = arith.constant 0 : i32
    return %c0_i32, %c0_i32_0 : i32, i32
  }
  func.func @transform_4(%arg0: i32) -> (i32, i32, i32) {
    %c0_i32 = arith.constant 0 : i32
    %c0_i32_0 = arith.constant 0 : i32
    %c0_i32_1 = arith.constant 0 : i32
    return %arg0, %c0_i32, %c0_i32_0 : i32, i32, i32
  }
}

</mosaic_0001>

<bundles_post_ra>
// kernel: conv_block1_forward.2
= control target key start
LH: loop header
LB: loop body
LE: loop exit
PB: predicated region body
PF: predicated region fallthrough
CT: control target
= control target key end

     0   :  { %s1126_s15 = smov 0   ;;  %s1337_s0 = inlined_call_operand.vmem [shape: f32[2,72,9], index: 0, kind: input, shape index: {}]   ;;  %s1338_s1 = inlined_call_operand.vmem [shape: f32[2,64,9], index: 1, kind: input, shape index: {}]   ;;  %s1339_s2 = inlined_call_operand.vmem [shape: f32[3,9,128], index: 2, kind: input, shape index: {}]   ;;  %s1340_s3 = inlined_call_operand.vmem [shape: f32[8,128], index: 3, kind: input, shape index: {}]   ;;  %s1341_s4 = inlined_call_operand.vmem [shape: f32[2,64,128], index: 4, kind: output, shape index: {}]  }
   0x1 LB: > { %s922_s16 = sadd.s32 4294967295, %s1099_s15   ;;  %p926_p0 = scmp.ge.s32.totalorder %s1099_s15, 1  ;;  %s1099_s15 = sphi %s1126_s15, %s14_s15  }
   0x2   : > { %p172_p1 = scmp.lt.s32.totalorder %s1099_s15, 3 }
   0x4   : > { %p173_p2 = pnand %p926_p0, %p172_p1 }
   0x5   : > { %p203_p3 = scmp.lt.s32.totalorder (!%p173_p2), %s922_s16, 1 }
   0x6   : > { %176 = sbr.rel (%p173_p2) target bundleno = 443 (0x1bb), region = 36 }
   0xb   : > { %v933_v0 = vld [vmem:[%s1339_s2 + $0x18] sm:$0x1]  ;;  %vm264_vm0 = vcmask 1040384   ;;  %v932_v1 = vld [vmem:[%s1339_s2 + $0x10] sm:$0xff]  ;;  %s1343_s16 = smov (!%p203_p3, %s922_s16), 1  ;;  %vm239_vm1 = vcmask 72704  }
   0xc   : > { %1048 = vmatprep.subr.msk.mxu1 %vm264_vm0, %v933_v0  ;;  %1000 = vmatprep.subr.msk.mxu0 %vm264_vm0, %v933_v0  ;;  %v227_v2 = vld [vmem:[%s1339_s2 + $0x8] sm:$0x1]  ;;  %s1052_s25 = smul.u32 72, %s1343_s16  ;;  %s968_s26 = sshll.u32 %s1343_s16, 6  ;;  %v226_v10 = vld [vmem:[%s1339_s2] sm:$0xff] }
   0xd   : > { %1050 = vmatpush3.msk.msra.mxu1 %vm264_vm0, %v933_v0  ;;  %1001 = vmatpush3.msk.msra.mxu0 %vm264_vm0, %v933_v0  ;;  %v953_v3 = vld [vmem:[%s1339_s2 + $0x28] sm:$0x1]  ;;  %s212_s29 = scalar_lea.vmem %s1338_s1, %s968_s26  ;;  %v952_v11 = vld [vmem:[%s1339_s2 + $0x20] sm:$0xff]  ;;  %s1315_s21 = scalar_lea.vmem %s1341_s4, %s968_s26 }
   0xe   : > { %1049 = vmatprep.subr.mxu1 %v932_v1  ;;  %1002 = vmatprep.subr.mxu0 %v932_v1  ;;  %v228_v4 = vld [vmem:[%s212_s29] sm:$0xff]  ;;  %v229_v6 = vld [vmem:[%s212_s29 + $0x8] sm:$0xff]  ;;  %v230_v8 = vld [vmem:[%s212_s29 + $0x10] sm:$0xff]  ;;  %s1166_s6 = scalar_lea.vmem %s1337_s0, %s1052_s25 }
   0xf   : > { %1051 = vmatpush3.msra.mxu1 %v932_v1  ;;  %1003 = vmatpush3.msra.mxu0 %v932_v1  ;;  %v232_v5 = vld [vmem:[%s212_s29 + $0x20] sm:$0xff]  ;;  %v233_v7 = vld [vmem:[%s212_s29 + $0x28] sm:$0xff]  ;;  %v234_v9 = vld [vmem:[%s212_s29 + $0x30] sm:$0xff] }
  0x10   : > { %1016 = vmatprep.subr.msk.mxu1 %vm264_vm0, %v227_v2  ;;  %1032 = vmatprep.subr.msk.mxu0 %vm264_vm0, %v953_v3  ;;  %v231_v12 = vld [vmem:[%s212_s29 + $0x18] sm:$0xff]  ;;  %v218_v14 = vld [vmem:[%s1166_s6] sm:$0xff]  ;;  %v505_v15 = vld [vmem:[%s1166_s6 + $0x8] sm:$0xff] }
  0x11   : > { %1004 = vmatprep.mubr.msk.f32.mxu0 %vm239_vm1, %v228_v4  ;;  %1010 = vmatprep.mubr.msk.f32.mxu1 %vm239_vm1, %v232_v5  ;;  %v235_v13 = vld [vmem:[%s212_s29 + $0x38] sm:$0xff]  ;;  %v506_v16 = vld [vmem:[%s1166_s6 + $0x10] sm:$0xff]  ;;  %v508_v18 = vld [vmem:[%s1166_s6 + $0x20] sm:$0xff] }
  0x12   : > { %1005 = vmatmul.mubr.msk.f32.vlgmr.msra.gmra.mxu0 %vm239_vm1, %v229_v6  ;;  %1011 = vmatmul.mubr.msk.f32.vlgmr.msra.gmra.mxu1 %vm239_vm1, %v233_v7  ;;  %v221_v17 = vld [vmem:[%s1166_s6 + $0x18] sm:$0xff]  ;;  %v223_v19 = vld [vmem:[%s1166_s6 + $0x28] sm:$0xff]  ;;  %v510_v20 = vld [vmem:[%s1166_s6 + $0x30] sm:$0xff] }
  0x13   : > { %1017 = vmatpush3.msk.msra.mxu1 %vm264_vm0, %v227_v2  ;;  %1033 = vmatpush3.msk.msra.mxu0 %vm264_vm0, %v953_v3  ;;  %v225_v21 = vld [vmem:[%s1166_s6 + $0x38] sm:$0xff]  ;;  %v512_v22 = vld [vmem:[%s1166_s6 + $0x40] sm:$0xff] }
  0x14   : > { %1007 = vmatprep.mubr.msk.f32.mxu0 %vm239_vm1, %v230_v8  ;;  %1013 = vmatprep.mubr.msk.f32.mxu1 %vm239_vm1, %v234_v9  ;;  %v963_v34 = vld [vmem:[%s1340_s3] ss:$0 sm:$0xff] }
  0x15   : > { %1018 = vmatprep.subr.mxu1 %v226_v10  ;;  %1034 = vmatprep.subr.mxu0 %v952_v11 }
  0x16   : > { %1008 = vmatmul.mubr.msk.f32.gmra.mxu0 %vm239_vm1, %v231_v12  ;;  %1014 = vmatmul.mubr.msk.f32.gmra.mxu1 %vm239_vm1, %v235_v13 }
  0x17   : > { %1019 = vmatpush3.msra.mxu1 %v226_v10  ;;  %1035 = vmatpush3.msra.mxu0 %v952_v11 }
  0x18   : > { %1020 = vmatprep.mubr.msk.f32.mxu1 %vm239_vm1, %v218_v14  ;;  %1036 = vmatprep.mubr.msk.f32.mxu0 %vm239_vm1, %v505_v15 }
  0x1a   : > { %1021 = vmatmul.mubr.msk.f32.vlgmr.msra.gmra.mxu1 %vm239_vm1, %v505_v15  ;;  %1037 = vmatmul.mubr.msk.f32.vlgmr.msra.gmra.mxu0 %vm239_vm1, %v506_v16 }
  0x1b   : > { %1023 = vmatprep.mubr.msk.f32.mxu1 %vm239_vm1, %v506_v16  ;;  %1039 = vmatprep.mubr.msk.f32.mxu0 %vm239_vm1, %v221_v17 }
  0x1e   : > { %1024 = vmatmul.mubr.msk.f32.gmra.mxu1 %vm239_vm1, %v221_v17  ;;  %1040 = vmatmul.mubr.msk.f32.gmra.mxu0 %vm239_vm1, %v508_v18 }
  0x1f   : > { %1026 = vmatprep.mubr.msk.f32.mxu1 %vm239_vm1, %v508_v18  ;;  %1042 = vmatprep.mubr.msk.f32.mxu0 %vm239_vm1, %v223_v19 }
  0x22   : > { %1027 = vmatmul.mubr.msk.f32.gmra.mxu1 %vm239_vm1, %v223_v19  ;;  %1043 = vmatmul.mubr.msk.f32.gmra.mxu0 %vm239_vm1, %v510_v20 }
  0x23   : > { %1029 = vmatprep.mubr.msk.f32.mxu1 %vm239_vm1, %v510_v20  ;;  %1045 = vmatprep.mubr.msk.f32.mxu0 %vm239_vm1, %v225_v21 }
  0x26   : > { %1030 = vmatmul.mubr.msk.f32.gmra.mxu1 %vm239_vm1, %v225_v21  ;;  %1046 = vmatmul.mubr.msk.f32.gmra.mxu0 %vm239_vm1, %v512_v22 }
  0xd2   : > { %v1006_v23 = vpop.f32.mrf.mxu0  ;;  %v1012_v24 = vpop.f32.mrf.mxu1 }
  0xd4   : > { %v334_v25 = vpop.f32.mrf.mxu0  ;;  %v354_v26 = vpop.f32.mrf.mxu1 }
  0xd6   : > { %v1009_v27 = vpop.f32.mrf.mxu0  ;;  %v1015_v28 = vpop.f32.mrf.mxu1 }
  0xd8   : > { %v344_v29 = vpop.f32.mrf.mxu0  ;;  %v364_v30 = vpop.f32.mrf.mxu1 }
  0xda   : > { %v1022_v31 = vpop.f32.mrf.mxu1  ;;  %v1038_v32 = vpop.f32.mrf.mxu0 }
  0xdb   : > { %v472_v33 = vadd.f32 %v1022_v31, %v1006_v23 }
  0xdc   : > { %v466_v35 = vpop.f32.mrf.mxu1  ;;  %v609_v36 = vpop.f32.mrf.mxu0 }
  0xdd   : > { %v649_v37 = vadd.f32 %v1038_v32, %v472_v33  ;;  %v467_v38 = vadd.f32 %v466_v35, %v334_v25 }
  0xde   : > { %v1025_v39 = vpop.f32.mrf.mxu1  ;;  %v1041_v40 = vpop.f32.mrf.mxu0 }
  0xdf   : > { %v1210_v41 = vadd.f32 %v963_v34, %v649_v37  ;;  %v648_v42 = vadd.f32 %v609_v36, %v467_v38  ;;  %v482_v43 = vadd.f32 %v1025_v39, %v1009_v27 }
  0xe0   : > { %v476_v44 = vpop.f32.mrf.mxu1  ;;  %v619_v45 = vpop.f32.mrf.mxu0 }
  0xe1   : > { %v477_v46 = vadd.f32 %v476_v44, %v344_v29  ;;  %v651_v47 = vadd.f32 %v1041_v40, %v482_v43  ;;  %671 = vadd.xlane.f32.xlu0 %v1210_v41  ;;  %v694_v48 = vmul.f32 %v1210_v41, %v1210_v41  ;;  %v1215_v50 = vadd.f32 %v963_v34, %v648_v42 }
  0xe2   : > { %v1028_v49 = vpop.f32.mrf.mxu1  ;;  %v1044_v53 = vpop.f32.mrf.mxu0 }
  0xe3   : > { %v650_v51 = vadd.f32 %v619_v45, %v477_v46  ;;  %703 = vadd.xlane.f32.xlu1 %v694_v48  ;;  %v1217_v54 = vadd.f32 %v963_v34, %v651_v47  ;;  %v693_v57 = vmul.f32 %v1215_v50, %v1215_v50  ;;  %v492_v60 = vadd.f32 %v1028_v49, %v1012_v24 }
  0xe4   : > { %v486_v52 = vpop.f32.mrf.mxu1  ;;  %v629_v59 = vpop.f32.mrf.mxu0 }
  0xe5   : > { %669 = vadd.xlane.f32.xlu0 %v1215_v50  ;;  %v1220_v55 = vadd.f32 %v963_v34, %v650_v51  ;;  %v487_v56 = vadd.f32 %v486_v52, %v354_v26  ;;  %v653_v1 = vadd.f32 %v1044_v53, %v492_v60  ;;  %v696_v2 = vmul.f32 %v1217_v54, %v1217_v54 }
  0xe6   : > { %v1031_v58 = vpop.f32.mrf.mxu1  ;;  %v1047_v0 = vpop.f32.mrf.mxu0 }
  0xe7   : > { %675 = vadd.xlane.f32.xlu1 %v1217_v54  ;;  %v652_v61 = vadd.f32 %v629_v59, %v487_v56  ;;  %v695_v62 = vmul.f32 %v1220_v55, %v1220_v55  ;;  %v1232_v6 = vadd.f32 %v963_v34, %v653_v1  ;;  %v502_v7 = vadd.f32 %v1031_v58, %v1015_v28  ;;  %v1274_v1 = vld [vmem:[%s1340_s3 + $0x1] ss:$0 sm:$0xff] }
  0xe8   : > { %v496_v63 = vpop.f32.mrf.mxu1  ;;  %v639_v5 = vpop.f32.mrf.mxu0 }
  0xe9   : > { %701 = vadd.xlane.f32.xlu0 %v693_v57  ;;  %v1230_v3 = vadd.f32 %v963_v34, %v652_v61  ;;  %v497_v4 = vadd.f32 %v496_v63, %v364_v30  ;;  %v655_v10 = vadd.f32 %v1047_v0, %v502_v7  ;;  %v698_v11 = vmul.f32 %v1232_v6, %v1232_v6 }
  0xeb   : > { %673 = vadd.xlane.f32.xlu1 %v1220_v55  ;;  %v654_v8 = vadd.f32 %v639_v5, %v497_v4  ;;  %v697_v9 = vmul.f32 %v1230_v3, %v1230_v3  ;;  %v1242_v13 = vadd.f32 %v963_v34, %v655_v10 }
  0xed   : > { %705 = vadd.xlane.f32.xlu0 %v695_v62  ;;  %v1240_v12 = vadd.f32 %v963_v34, %v654_v8  ;;  %v700_v15 = vmul.f32 %v1242_v13, %v1242_v13 }
  0xef   : > { %707 = vadd.xlane.f32.xlu1 %v696_v2  ;;  %v699_v14 = vmul.f32 %v1240_v12, %v1240_v12 }
  0xf1   : > { %677 = vadd.xlane.f32.xlu0 %v1230_v3 }
  0xf3   : > { %679 = vadd.xlane.f32.xlu1 %v1232_v6 }
  0xf5   : > { %709 = vadd.xlane.f32.xlu0 %v697_v9 }
  0xf7   : > { %711 = vadd.xlane.f32.xlu1 %v698_v11 }
  0xf9   : > { %681 = vadd.xlane.f32.xlu0 %v1240_v12 }
  0xfb   : > { %683 = vadd.xlane.f32.xlu1 %v1242_v13 }
  0xfd   : > { %713 = vadd.xlane.f32.xlu0 %v699_v14 }
  0xff   : > { %715 = vadd.xlane.f32.xlu1 %v700_v15 }
 0x16a   : > { %v672_v16 = vpop.xlane.xlu0 %671 }
 0x16b   : > { %v686_v17 = vmul.f32 0.125, %v672_v16 }
 0x16c   : > { %v704_v18 = vpop.xlane.xlu1 %703 }
 0x16d   : > { %v726_v19 = vmul.f32 %v686_v17, %v686_v17  ;;  %v718_v20 = vmul.f32 0.125, %v704_v18  ;;  %v750_v59 = vsub.f32 %v1210_v41, %v686_v17  ;;  %v1279_v41 = vld [vmem:[%s1340_s3 + $0x2] ss:$0 sm:$0xff] }
 0x16e   : > { %v670_v21 = vpop.xlane.xlu0 %669 }
 0x16f   : > { %v734_v22 = vsub.f32 %v718_v20, %v726_v19  ;;  %v1250_v23 = vmul.f32 0.125, %v670_v21 }
 0x170   : > { %v676_v24 = vpop.xlane.xlu1 %675 }
 0x171   : > { %v742_v25 = vmax.f32 %v734_v22, 0.0  ;;  %v725_v28 = vmul.f32 %v1250_v23, %v1250_v23  ;;  %v1254_v31 = vmul.f32 0.125, %v676_v24  ;;  %v749_v15 = vsub.f32 %v1215_v50, %v1250_v23 }
 0x172   : > { %v702_v26 = vpop.xlane.xlu0 %701 }
 0x173   : > { %v758_v27 = vadd.f32 1e-06, %v742_v25  ;;  %v717_v29 = vmul.f32 0.125, %v702_v26  ;;  %v728_v39 = vmul.f32 %v1254_v31, %v1254_v31 }
 0x174   : > { %v674_v30 = vpop.xlane.xlu1 %673 }
 0x175   : > { %1061 = vrsqrt.f32 %v758_v27  ;;  %v733_v32 = vsub.f32 %v717_v29, %v725_v28  ;;  %v1256_v33 = vmul.f32 0.125, %v674_v30 }
 0x176   : > { %v706_v34 = vpop.xlane.xlu0 %705 }
 0x177   : > { %v741_v35 = vmax.f32 %v733_v32, 0.0  ;;  %v727_v36 = vmul.f32 %v1256_v33, %v1256_v33  ;;  %v719_v37 = vmul.f32 0.125, %v706_v34  ;;  %v751_v29 = vsub.f32 %v1220_v55, %v1256_v33 }
 0x178   : > { %v708_v38 = vpop.xlane.xlu1 %707 }
 0x179   : > { %v757_v40 = vadd.f32 1e-06, %v741_v35  ;;  %v735_v42 = vsub.f32 %v719_v37, %v727_v36  ;;  %v720_v43 = vmul.f32 0.125, %v708_v38  ;;  %v752_v35 = vsub.f32 %v1217_v54, %v1254_v31 }
 0x17a   : > { %v678_v44 = vpop.xlane.xlu0 %677 }
 0x17b   : > { %1063 = vrsqrt.f32 %v757_v40  ;;  %v743_v45 = vmax.f32 %v735_v42, 0.0  ;;  %v736_v46 = vsub.f32 %v720_v43, %v728_v39  ;;  %v1262_v47 = vmul.f32 0.125, %v678_v44 }
 0x17c   : > { %v680_v48 = vpop.xlane.xlu1 %679 }
 0x17d   : > { %v759_v49 = vadd.f32 1e-06, %v743_v45  ;;  %v744_v51 = vmax.f32 %v736_v46, 0.0  ;;  %v1264_v52 = vmul.f32 0.125, %v680_v48  ;;  %v729_v57 = vmul.f32 %v1262_v47, %v1262_v47 }
 0x17e   : > { %v710_v53 = vpop.xlane.xlu0 %709  ;;  %v753_v31 = vsub.f32 %v1230_v3, %v1262_v47 }
 0x17f   : > { %1065 = vrsqrt.f32 %v759_v49  ;;  %v760_v56 = vadd.f32 1e-06, %v744_v51  ;;  %v721_v58 = vmul.f32 0.125, %v710_v53  ;;  %v730_v61 = vmul.f32 %v1264_v52, %v1264_v52 }
 0x180   : > { %v712_v60 = vpop.xlane.xlu1 %711  ;;  %v754_v51 = vsub.f32 %v1232_v6, %v1264_v52 }
 0x181   : > { %1067 = vrsqrt.f32 %v760_v56  ;;  %v737_v62 = vsub.f32 %v721_v58, %v729_v57  ;;  %v722_v63 = vmul.f32 0.125, %v712_v60 }
 0x182   : > { %v1062_v0 = vpop.eup %1061  ;;  %v682_v2 = vpop.xlane.xlu0 %681 }
 0x183   : > { %v774_v4 = vmul.f32 %v1062_v0, %v750_v59  ;;  %v745_v5 = vmax.f32 %v737_v62, 0.0  ;;  %v738_v7 = vsub.f32 %v722_v63, %v730_v61  ;;  %v1281_v8 = vmul.f32 0.125, %v682_v2 }
 0x184   : > { %v684_v9 = vpop.xlane.xlu1 %683 }
 0x185   : > { %v787_v10 = vmul.f32 %v1274_v1, %v774_v4  ;;  %v761_v11 = vadd.f32 1e-06, %v745_v5  ;;  %v746_v14 = vmax.f32 %v738_v7, 0.0  ;;  %v1286_v16 = vmul.f32 0.125, %v684_v9 }
 0x186   : > { %v714_v17 = vpop.xlane.xlu0 %713  ;;  %v731_v22 = vmul.f32 %v1281_v8, %v1281_v8  ;;  %v755_v52 = vsub.f32 %v1240_v12, %v1281_v8 }
 0x187   : > { %v800_v18 = vadd.f32 %v1279_v41, %v787_v10  ;;  %1069 = vrsqrt.f32 %v761_v11  ;;  %v762_v19 = vadd.f32 1e-06, %v746_v14  ;;  %v723_v20 = vmul.f32 0.125, %v714_v17 }
 0x188   : > { %v1064_v21 = vpop.eup %1063  ;;  %v716_v24 = vpop.xlane.xlu1 %715  ;;  %v732_v27 = vmul.f32 %v1286_v16, %v1286_v16  ;;  %v756_v5 = vsub.f32 %v1242_v13, %v1286_v16 }
 0x189   : > { %v816_v25 = vmul.f32 0.70710677, %v800_v18  ;;  %v773_v26 = vmul.f32 %v1064_v21, %v749_v15  ;;  %1071 = vrsqrt.f32 %v762_v19  ;;  %v739_v50 = vsub.f32 %v723_v20, %v731_v22 }
 0x18a   : > { %v724_v23 = vmul.f32 0.125, %v716_v24  ;;  %v808_v60 = vmul.f32 0.5, %v800_v18 }
 0x18b   : > { %1073 = verf.f32 %v816_v25  ;;  %v786_v28 = vmul.f32 %v1274_v1, %v773_v26  ;;  %v747_v32 = vmax.f32 %v739_v50, 0.0 }
 0x18c   : > { %v1066_v30 = vpop.eup %1065  ;;  %v740_v34 = vsub.f32 %v724_v23, %v732_v27 }
 0x18d   : > { %v799_v36 = vadd.f32 %v1279_v41, %v786_v28  ;;  %v775_v37 = vmul.f32 %v1066_v30, %v751_v29  ;;  %v763_v39 = vadd.f32 1e-06, %v747_v32 }
 0x18e   : > { %v1068_v38 = vpop.eup %1067  ;;  %v748_v40 = vmax.f32 %v740_v34, 0.0 }
 0x18f   : > { %v815_v42 = vmul.f32 0.70710677, %v799_v36  ;;  %v788_v43 = vmul.f32 %v1274_v1, %v775_v37  ;;  %v776_v44 = vmul.f32 %v1068_v38, %v752_v35  ;;  %1075 = vrsqrt.f32 %v763_v39 }
 0x190   : > { %v764_v45 = vadd.f32 1e-06, %v748_v40  ;;  %v807_v10 = vmul.f32 0.5, %v799_v36 }
 0x191   : > { %1077 = verf.f32 %v815_v42  ;;  %v801_v55 = vadd.f32 %v1279_v41, %v788_v43  ;;  %v789_v33 = vmul.f32 %v1274_v1, %v776_v44 }
 0x192   : > { %1079 = vrsqrt.f32 %v764_v45 }
 0x193   : > { %v817_v46 = vmul.f32 0.70710677, %v801_v55  ;;  %v802_v54 = vadd.f32 %v1279_v41, %v789_v33  ;;  %v809_v19 = vmul.f32 0.5, %v801_v55 }
 0x194   : > { %v1070_v48 = vpop.eup %1069 }
 0x195   : > { %1081 = verf.f32 %v817_v46  ;;  %v818_v49 = vmul.f32 0.70710677, %v802_v54  ;;  %v777_v53 = vmul.f32 %v1070_v48, %v753_v31  ;;  %v810_v24 = vmul.f32 0.5, %v802_v54 }
 0x196   : > { %v1072_v56 = vpop.eup %1071 }
 0x197   : > { %1083 = verf.f32 %v818_v49  ;;  %v790_v57 = vmul.f32 %v1274_v1, %v777_v53  ;;  %v778_v58 = vmul.f32 %v1072_v56, %v754_v51 }
 0x198   : > { %v1074_v59 = vpop.eup %1073 }
 0x199   : > { %v832_v61 = vadd.f32 1.0, %v1074_v59  ;;  %v803_v62 = vadd.f32 %v1279_v41, %v790_v57  ;;  %v791_v63 = vmul.f32 %v1274_v1, %v778_v58 }
 0x19b   : > { %v840_v3 = vmul.f32 %v832_v61, %v808_v60  ;;  %v819_v6 = vmul.f32 0.70710677, %v803_v62  ;;  %v804_v47 = vadd.f32 %v1279_v41, %v791_v63 }
 0x19c   : > { %v1076_v0 = vpop.eup %1075 }
 0x19d   : > { %848 = vst [vmem:[%s1315_s21 + $0x8] sm:$0xff] %v840_v3  ;;  %1085 = verf.f32 %v819_v6  ;;  %v820_v2 = vmul.f32 0.70710677, %v804_v47  ;;  %v779_v7 = vmul.f32 %v1076_v0, %v755_v52  ;;  %v812_v30 = vmul.f32 0.5, %v804_v47 }
 0x19e   : > { %v1078_v4 = vpop.eup %1077 }
 0x19f   : > { %v1080_v9 = vpop.eup %1079  ;;  %v831_v11 = vadd.f32 1.0, %v1078_v4  ;;  %1087 = verf.f32 %v820_v2  ;;  %v792_v14 = vmul.f32 %v1274_v1, %v779_v7 }
 0x1a0   : > { %v780_v15 = vmul.f32 %v1080_v9, %v756_v5 }
 0x1a1   : > { %v839_v17 = vmul.f32 %v831_v11, %v807_v10  ;;  %v805_v8 = vadd.f32 %v1279_v41, %v792_v14 }
 0x1a2   : > { %v1082_v12 = vpop.eup %1081  ;;  %v793_v18 = vmul.f32 %v1274_v1, %v780_v15  ;;  %v811_v1 = vmul.f32 0.5, %v803_v62 }
 0x1a3   : > { %847 = vst [vmem:[%s1315_s21] sm:$0xff] %v839_v17  ;;  %v833_v20 = vadd.f32 1.0, %v1082_v12  ;;  %v821_v16 = vmul.f32 0.70710677, %v805_v8  ;;  %v813_v35 = vmul.f32 0.5, %v805_v8 }
 0x1a4   : > { %v1084_v13 = vpop.eup %1083  ;;  %v806_v21 = vadd.f32 %v1279_v41, %v793_v18 }
 0x1a5   : > { %v841_v22 = vmul.f32 %v833_v20, %v809_v19  ;;  %v834_v25 = vadd.f32 1.0, %v1084_v13  ;;  %1089 = verf.f32 %v821_v16 }
 0x1a6   : > { %v822_v26 = vmul.f32 0.70710677, %v806_v21  ;;  %v814_v39 = vmul.f32 0.5, %v806_v21 }
 0x1a7   : > { %849 = vst [vmem:[%s1315_s21 + $0x10] sm:$0xff] %v841_v22  ;;  %v842_v27 = vmul.f32 %v834_v25, %v810_v24 }
 0x1a8   : > { %1091 = verf.f32 %v822_v26 }
 0x1a9   : > { %850 = vst [vmem:[%s1315_s21 + $0x18] sm:$0xff] %v842_v27 }
 0x1aa   : > { %v1086_v50 = vpop.eup %1085 }
 0x1ab   : > { %v835_v23 = vadd.f32 1.0, %v1086_v50 }
 0x1ac   : > { %v1088_v28 = vpop.eup %1087 }
 0x1ad   : > { %v843_v29 = vmul.f32 %v835_v23, %v811_v1  ;;  %v836_v41 = vadd.f32 1.0, %v1088_v28 }
 0x1af   : > { %851 = vst [vmem:[%s1315_s21 + $0x20] sm:$0xff] %v843_v29  ;;  %v844_v32 = vmul.f32 %v836_v41, %v812_v30 }
 0x1b1   : > { %852 = vst [vmem:[%s1315_s21 + $0x28] sm:$0xff] %v844_v32 }
 0x1b2   : > { %v1090_v34 = vpop.eup %1089 }
 0x1b3   : > { %v837_v36 = vadd.f32 1.0, %v1090_v34 }
 0x1b5   : > { %v1092_v37 = vpop.eup %1091  ;;  %v845_v38 = vmul.f32 %v837_v36, %v813_v35 }
 0x1b6   : > { %v838_v40 = vadd.f32 1.0, %v1092_v37 }
 0x1b7   : > { %853 = vst [vmem:[%s1315_s21 + $0x30] sm:$0xff] %v845_v38 }
 0x1b8   : > { %v846_v42 = vmul.f32 %v838_v40, %v814_v39 }
 0x1ba   : > { %854 = vst [vmem:[%s1315_s21 + $0x38] sm:$0xff] %v846_v42 }
 0x1bb PF: > { %s14_s15 = sadd.s32 1, %s1099_s15  }
 0x1bc   : > { %p11_p4 = scmp.ge.s32.totalorder %s14_s15, 4  }
 0x1be   :  { %13 = sbr.rel (!%p11_p4) target bundleno = 1 (0x1), region = 71 }

// kernel: conv_block1_forward.3
= control target key start
LH: loop header
LB: loop body
LE: loop exit
PB: predicated region body
PF: predicated region fallthrough
CT: control target
= control target key end

     0   :  { %s730_s15 = smov 0   ;;  %s800_s0 = inlined_call_operand.vmem [shape: f32[2,20,24], index: 0, kind: input, shape index: {}]   ;;  %s801_s1 = inlined_call_operand.vmem [shape: f32[2,16,24], index: 1, kind: input, shape index: {}]   ;;  %s802_s2 = inlined_call_operand.vmem [shape: f32[3,24,128], index: 2, kind: input, shape index: {}]   ;;  %s803_s3 = inlined_call_operand.vmem [shape: f32[8,128], index: 3, kind: input, shape index: {}]   ;;  %s804_s4 = inlined_call_operand.vmem [shape: f32[2,16,128], index: 4, kind: output, shape index: {}]  }
   0x1 LB: > { %s609_s16 = sadd.s32 4294967295, %s703_s15   ;;  %p613_p0 = scmp.ge.s32.totalorder %s703_s15, 1  ;;  %s703_s15 = sphi %s730_s15, %s14_s15  }
   0x2   : > { %p172_p1 = scmp.lt.s32.totalorder %s703_s15, 3 }
   0x4   : > { %p173_p2 = pnand %p613_p0, %p172_p1 }
   0x5   : > { %p203_p3 = scmp.lt.s32.totalorder (!%p173_p2), %s609_s16, 1 }
   0x6   : > { %176 = sbr.rel (%p173_p2) target bundleno = 417 (0x1a1), region = 36 }
   0xb   : > { %v621_v0 = vld [vmem:[%s802_s2 + $0x28] sm:$0xff]  ;;  %v620_v1 = vld [vmem:[%s802_s2 + $0x20] sm:$0xff]  ;;  %v222_v2 = vld [vmem:[%s802_s2 + $0x10] sm:$0xff]  ;;  %s806_s16 = smov (!%p203_p3, %s609_s16), 1  ;;  %vm229_vm0 = vcmask 195584  }
   0xc   : > { %653 = vmatprep.subr.mxu0 %v621_v0  ;;  %662 = vmatprep.subr.mxu1 %v222_v2  ;;  %v221_v3 = vld [vmem:[%s802_s2 + $0x8] sm:$0xff]  ;;  %v619_v4 = vld [vmem:[%s802_s2 + $0x18] sm:$0xff]  ;;  %v220_v5 = vld [vmem:[%s802_s2] sm:$0xff]  ;;  %s636_s29 = sshll.u32 %s806_s16, 4  ;;  %s680_s6 = smul.u32 24, %s806_s16 }
   0xd   : > { %654 = vmatpush3.msra.mxu0 %v621_v0  ;;  %663 = vmatpush3.msra.mxu1 %v222_v2  ;;  %v628_v6 = vld [vmem:[%s802_s2 + $0x40] sm:$0xff]  ;;  %s212_s9 = scalar_lea.vmem %s801_s1, %s636_s29  ;;  %v627_v9 = vld [vmem:[%s802_s2 + $0x38] sm:$0xff]  ;;  %v626_v13 = vld [vmem:[%s802_s2 + $0x30] sm:$0xff]  ;;  %s217_s27 = scalar_lea.vmem %s804_s4, %s636_s29 }
   0xe   : > { %655 = vmatprep.subr.mxu0 %v620_v1  ;;  %664 = vmatprep.subr.mxu1 %v221_v3  ;;  %v223_v7 = vld [vmem:[%s212_s9] sm:$0xff]  ;;  %v224_v8 = vld [vmem:[%s212_s9 + $0x8] sm:$0xff]  ;;  %s207_s12 = scalar_lea.vmem %s800_s0, %s680_s6 }
   0xf   : > { %656 = vmatpush3.msra.mxu0 %v620_v1  ;;  %665 = vmatpush3.msra.mxu1 %v221_v3  ;;  %v218_v10 = vld [vmem:[%s207_s12] sm:$0xff]  ;;  %v219_v11 = vld [vmem:[%s207_s12 + $0x8] sm:$0xff] }
  0x10   : > { %657 = vmatprep.subr.mxu0 %v619_v4  ;;  %666 = vmatprep.subr.mxu1 %v220_v5  ;;  %v392_v12 = vld [vmem:[%s207_s12 + $0x4] sm:$0xff]  ;;  %v393_v14 = vld [vmem:[%s207_s12 + $0xc] sm:$0xff]  ;;  %v631_v25 = vld [vmem:[%s803_s3] ss:$0 sm:$0xff] }
  0x11   : > { %658 = vmatpush3.msra.mxu0 %v619_v4  ;;  %667 = vmatpush3.msra.mxu1 %v220_v5  ;;  %v632_v48 = vld [vmem:[%s803_s3 + $0x1] ss:$0 sm:$0xff]  ;;  %v633_v50 = vld [vmem:[%s803_s3 + $0x2] ss:$0 sm:$0xff] }
  0x12   : > { %659 = vmatprep.mubr.msk.f32.mxu0 %vm229_vm0, %v223_v7  ;;  %671 = vmatprep.subr.mxu0 %v628_v6 }
  0x13   : > { %660 = vmatmul.mubr.msk.f32.vlgmr.msra.gmra.mxu0 %vm229_vm0, %v224_v8  ;;  %668 = vmatprep.mubr.msk.f32.mxu1 %vm229_vm0, %v218_v10 }
  0x14   : > { %672 = vmatpush3.msra.mxu0 %v628_v6  ;;  %669 = vmatmul.mubr.msk.f32.vlgmr.msra.gmra.mxu1 %vm229_vm0, %v219_v11 }
  0x15   : > { %673 = vmatprep.subr.mxu0 %v627_v9  ;;  %677 = vmatprep.mubr.msk.f32.mxu0 %vm229_vm0, %v392_v12 }
  0x16   : > { %674 = vmatpush3.msra.mxu0 %v627_v9 }
  0x17   : > { %675 = vmatprep.subr.mxu0 %v626_v13 }
  0x18   : > { %676 = vmatpush3.msra.mxu0 %v626_v13 }
  0x19   : > { %678 = vmatmul.mubr.msk.f32.vlgmr.msra.gmra.mxu0 %vm229_vm0, %v393_v14 }
  0xd3   : > { %v661_v15 = vpop.f32.mrf.mxu0 }
  0xd4   : > { %v670_v16 = vpop.f32.mrf.mxu1 }
  0xd5   : > { %v302_v17 = vpop.f32.mrf.mxu0  ;;  %v389_v20 = vadd.f32 %v670_v16, %v661_v15 }
  0xd6   : > { %v383_v18 = vpop.f32.mrf.mxu1 }
  0xd7   : > { %v384_v21 = vadd.f32 %v383_v18, %v302_v17 }
  0xd9   : > { %v679_v19 = vpop.f32.mrf.mxu0 }
  0xda   : > { %v480_v23 = vadd.f32 %v679_v19, %v389_v20 }
  0xdb   : > { %v470_v22 = vpop.f32.mrf.mxu0 }
  0xdc   : > { %v479_v24 = vadd.f32 %v470_v22, %v384_v21  ;;  %v487_v27 = vadd.f32 %v631_v25, %v480_v23 }
  0xde   : > { %v486_v26 = vadd.f32 %v631_v25, %v479_v24  ;;  %v495_v29 = vmul.f32 %v487_v27, %v487_v27 }
  0xe0   : > { %488 = vadd.xlane.f32.xlu0 %v486_v26  ;;  %v494_v28 = vmul.f32 %v486_v26, %v486_v26 }
  0xe2   : > { %496 = vadd.xlane.f32.xlu1 %v494_v28 }
  0xe4   : > { %490 = vadd.xlane.f32.xlu0 %v487_v27 }
  0xe6   : > { %498 = vadd.xlane.f32.xlu1 %v495_v29 }
 0x169   : > { %v489_v30 = vpop.xlane.xlu0 %488 }
 0x16a   : > { %v492_v31 = vmul.f32 0.0625, %v489_v30 }
 0x16b   : > { %v497_v32 = vpop.xlane.xlu1 %496 }
 0x16c   : > { %v502_v33 = vmul.f32 %v492_v31, %v492_v31  ;;  %v500_v34 = vmul.f32 0.0625, %v497_v32  ;;  %v508_v46 = vsub.f32 %v486_v26, %v492_v31 }
 0x16d   : > { %v491_v35 = vpop.xlane.xlu0 %490 }
 0x16e   : > { %v504_v36 = vsub.f32 %v500_v34, %v502_v33  ;;  %v493_v37 = vmul.f32 0.0625, %v491_v35 }
 0x16f   : > { %v499_v38 = vpop.xlane.xlu1 %498 }
 0x170   : > { %v506_v39 = vmax.f32 %v504_v36, 0.0  ;;  %v503_v40 = vmul.f32 %v493_v37, %v493_v37  ;;  %v501_v41 = vmul.f32 0.0625, %v499_v38  ;;  %v509_v52 = vsub.f32 %v487_v27, %v493_v37 }
 0x172   : > { %v510_v42 = vadd.f32 1e-06, %v506_v39  ;;  %v505_v43 = vsub.f32 %v501_v41, %v503_v40 }
 0x174   : > { %689 = vrsqrt.f32 %v510_v42  ;;  %v507_v44 = vmax.f32 %v505_v43, 0.0 }
 0x176   : > { %v511_v45 = vadd.f32 1e-06, %v507_v44 }
 0x178   : > { %691 = vrsqrt.f32 %v511_v45 }
 0x181   : > { %v690_v47 = vpop.eup %689 }
 0x182   : > { %v514_v49 = vmul.f32 %v690_v47, %v508_v46 }
 0x184   : > { %v521_v51 = vmul.f32 %v632_v48, %v514_v49 }
 0x185   : > { %v692_v53 = vpop.eup %691 }
 0x186   : > { %v528_v54 = vadd.f32 %v633_v50, %v521_v51  ;;  %v515_v55 = vmul.f32 %v692_v53, %v509_v52 }
 0x188   : > { %v532_v56 = vmul.f32 0.70710677, %v528_v54  ;;  %v522_v57 = vmul.f32 %v632_v48, %v515_v55  ;;  %v530_v61 = vmul.f32 0.5, %v528_v54 }
 0x18a   : > { %693 = verf.f32 %v532_v56  ;;  %v529_v58 = vadd.f32 %v633_v50, %v522_v57 }
 0x18c   : > { %v533_v59 = vmul.f32 0.70710677, %v529_v58  ;;  %v531_v1 = vmul.f32 0.5, %v529_v58 }
 0x18e   : > { %695 = verf.f32 %v533_v59 }
 0x197   : > { %v694_v60 = vpop.eup %693 }
 0x198   : > { %v536_v62 = vadd.f32 1.0, %v694_v60 }
 0x19a   : > { %v538_v63 = vmul.f32 %v536_v62, %v530_v61 }
 0x19b   : > { %v696_v0 = vpop.eup %695 }
 0x19c   : > { %540 = vst [vmem:[%s217_s27] sm:$0xff] %v538_v63  ;;  %v537_v2 = vadd.f32 1.0, %v696_v0 }
 0x19e   : > { %v539_v3 = vmul.f32 %v537_v2, %v531_v1 }
 0x1a0   : > { %541 = vst [vmem:[%s217_s27 + $0x8] sm:$0xff] %v539_v3 }
 0x1a1 PF: > { %s14_s15 = sadd.s32 1, %s703_s15  }
 0x1a2   : > { %p11_p4 = scmp.ge.s32.totalorder %s14_s15, 4  }
 0x1a4   :  { %13 = sbr.rel (!%p11_p4) target bundleno = 1 (0x1), region = 71 }

</bundles_post_ra>
